<compile_context>
chip_gen: v7x
topology: tpu7x:2x2x1
jax: 0.10.0
libtpu: 0.0.40
codegen_flags: <defaults>
</compile_context>

<pallas_src>
import math
from functools import partial

import jax
import jax.numpy as jnp
from jax import lax
from jax.experimental import pallas as pl
from jax.experimental.pallas import tpu as pltpu


def _round_up(x, m):
    return ((x + m - 1) // m) * m


# ---------------------------------------------------------------------------
# Pallas kernel 1: fused GCN forward hot path, out = adj @ (x @ W).T
#   grid = (N_tiles, M_tiles); N outer, M inner.
#   support_tile = x_tile @ W           computed once per N tile (pl.when)
#   out_tile     = contract(adj_tile, support_tile)  over the Fout axis of
#                  BOTH operands (== adj @ support.T, NT form the MXU consumes
#                  directly — same pattern as q @ k.T in flash attention, so
#                  no explicit XLU transpose is materialized).
# ---------------------------------------------------------------------------
def _gcn_forward_kernel(adj_ref, x_ref, w_ref, out_ref, supp_ref):
    @pl.when(pl.program_id(1) == 0)          # first M tile of this N tile
    def _():
        supp_ref[...] = jnp.dot(x_ref[...], w_ref[...],
                                preferred_element_type=jnp.float32)  # (tn, Fout)

    out_ref[...] = lax.dot_general(
        adj_ref[...], supp_ref[...],
        dimension_numbers=(((1,), (1,)), ((), ())),                  # contract Fout
        preferred_element_type=jnp.float32,
    ).astype(out_ref.dtype)                                          # (tm, tn)


@partial(jax.jit, static_argnames=("tm", "tn"))
def gcn_forward(x, weight, adj, *, tm=512, tn=2048):
    """output = adj @ (x @ weight).T, returned as float32 of shape (M, N)."""
    N, Fin = x.shape
    Fin2, Fout = weight.shape
    M, Fout2 = adj.shape
    assert Fin == Fin2 and Fout == Fout2

    x = x.astype(jnp.float32)
    weight = weight.astype(jnp.float32)
    adj = adj.astype(jnp.float32)

    # Lane-dense output tiles (tn multiple of 128, tm multiple of 8), clamped
    # to the (rounded-up) problem size.  No input padding / output slicing:
    # boundary tiles are masked by Pallas; garbage rows in partial input
    # blocks feed only masked output rows/cols, so results are exact.
    tn_eff = _round_up(min(tn, _round_up(N, 128)), 128)
    tm_eff = _round_up(min(tm, _round_up(M, 8)), 8)

    grid_n = pl.cdiv(N, tn_eff)
    grid_m = pl.cdiv(M, tm_eff)

    cost = pl.CostEstimate(
        flops=2 * (N * Fin * Fout + M * N * Fout),
        transcendentals=0,
        bytes_accessed=4 * (N * Fin                 # x: read once per N tile
                            + grid_n * M * Fout     # adj: re-read per N tile
                            + grid_n * Fin * Fout   # W
                            + M * N),               # output write (dominant)
    )

    # Actual double-buffered VMEM working set + headroom, capped well under the
    # 64 MiB physical VMEM of a v7x TensorCore.
    vmem_bytes = (2 * 4 * (tm_eff * tn_eff + tm_eff * Fout
                           + tn_eff * Fin + Fin * Fout)
                  + 4 * tn_eff * Fout            # support scratch
                  + (8 << 20))                   # compiler-internal slack
    vmem_bytes = int(min(vmem_bytes, 48 << 20))

    # TODO(synk): if downstream tolerates bf16 activations, emit the output in
    # bf16 (keep f32 accumulation) — halves the dominant HBM write, biggest on v5e.
    return pl.pallas_call(
        _gcn_forward_kernel,
        out_shape=jax.ShapeDtypeStruct((M, N), jnp.float32),
        grid=(grid_n, grid_m),
        in_specs=[
            pl.BlockSpec((tm_eff, Fout), lambda j, i: (i, 0)),   # adj row tile
            pl.BlockSpec((tn_eff, Fin), lambda j, i: (j, 0)),    # x row tile
            pl.BlockSpec((Fin, Fout), lambda j, i: (0, 0)),      # whole W (tiny)
        ],
        out_specs=pl.BlockSpec((tm_eff, tn_eff), lambda j, i: (i, j)),
        scratch_shapes=[pltpu.VMEM((tn_eff, Fout), jnp.float32)],
        compiler_params=pltpu.CompilerParams(
            dimension_semantics=("parallel", "arbitrary"),
            vmem_limit_bytes=vmem_bytes,
        ),
        cost_estimate=cost,
    )(adj, x, weight)


# ---------------------------------------------------------------------------
# Pallas kernel 2: mat_LSTM_cell weight evolution (runs ONCE at init time,
# producing dgcn_weight from time_weight, i.e. the time_step >= 1 path).
#   update = sigmoid(Wu @ Q + Uu @ Q + bu)
#   reset  = sigmoid(Wr @ Q + Ur @ Q + br)
#   h_cap  = tanh(Wh @ Q + Uh @ (reset * Q) + bh)
#   new_Q  = (1 - update) * Q + update * h_cap
# Tiled over the cols axis (columns are independent); W/U stay whole blocks.
# (The TopK submodule is instantiated in the PyTorch cell but never used in
#  its forward, so it is intentionally not implemented.)
# TODO(synk): for in_features >= ~2048 the six (rows,rows) f32 gate matrices
#             need a K-reduction grid axis as well to stay inside v7x VMEM.
# ---------------------------------------------------------------------------
def _mat_lstm_cell_kernel(q_ref, wu_ref, uu_ref, bu_ref,
                          wr_ref, ur_ref, br_ref,
                          wh_ref, uh_ref, bh_ref, out_ref):
    q = q_ref[...]

    def gate(w, u, b, h):
        return (jnp.dot(w, q, preferred_element_type=jnp.float32)
                + jnp.dot(u, h, preferred_element_type=jnp.float32)
                + b)

    update = jax.nn.sigmoid(gate(wu_ref[...], uu_ref[...], bu_ref[...], q))
    reset = jax.nn.sigmoid(gate(wr_ref[...], ur_ref[...], br_ref[...], q))
    h_cap = jnp.tanh(gate(wh_ref[...], uh_ref[...], bh_ref[...], reset * q))
    out_ref[...] = ((1.0 - update) * q + update * h_cap).astype(out_ref.dtype)


def evolve_weights(prev_q, params, *, tc=512):
    rows, cols = prev_q.shape
    tc_eff = _round_up(min(tc, _round_up(cols, 128)), 128)
    grid_c = pl.cdiv(cols, tc_eff)
    sq = pl.BlockSpec((rows, rows), lambda j: (0, 0))      # W / U : whole
    ct = pl.BlockSpec((rows, tc_eff), lambda j: (0, j))    # Q / bias / out tile
    return pl.pallas_call(
        _mat_lstm_cell_kernel,
        out_shape=jax.ShapeDtypeStruct((rows, cols), jnp.float32),
        grid=(grid_c,),
        in_specs=[ct, sq, sq, ct, sq, sq, ct, sq, sq, ct],
        out_specs=ct,
        compiler_params=pltpu.CompilerParams(
            dimension_semantics=("parallel",)),
    )(prev_q.astype(jnp.float32),
      params["Wu"], params["Uu"], params["bu"],
      params["Wr"], params["Ur"], params["br"],
      params["Wh"], params["Uh"], params["bh"])


# ---------------------------------------------------------------------------
# Module wrapper (plain-JAX glue: deterministic parameter init + reshape)
# ---------------------------------------------------------------------------
class GraphConvolutionPallas:
    def __init__(self, in_features, out_features, time_step, time_weight,
                 bias=False, key=None):
        self.in_features = in_features
        self.out_features = out_features
        self.time_step = time_step
        key = jax.random.PRNGKey(0) if key is None else key
        keys = jax.random.split(key, 8)

        # static GCN weight (used when time_step < 1), uniform(-stdv, stdv)
        stdv = 1.0 / math.sqrt(out_features)
        self.weight = jax.random.uniform(
            keys[0], (in_features, out_features), jnp.float32, -stdv, stdv)
        self.bias = None  # module is constructed with bias=False in this demo

        # mat_LSTM_cell gate parameters: W,U ~ (rows, rows), bias zeros (rows, cols)
        rows, cols = in_features, out_features
        gstdv = 1.0 / math.sqrt(rows)

        def gp(k):
            return jax.random.uniform(k, (rows, rows), jnp.float32, -gstdv, gstdv)

        self.cell_params = {
            "Wu": gp(keys[1]), "Uu": gp(keys[2]), "bu": jnp.zeros((rows, cols), jnp.float32),
            "Wr": gp(keys[3]), "Ur": gp(keys[4]), "br": jnp.zeros((rows, cols), jnp.float32),
            "Wh": gp(keys[5]), "Uh": gp(keys[6]), "bh": jnp.zeros((rows, cols), jnp.float32),
        }

        if self.time_step >= 1:
            self.dgcn_weight = evolve_weights(
                time_weight.astype(jnp.float32), self.cell_params)

    def forward(self, inputs, adj):
        first_weight = self.dgcn_weight if self.time_step >= 1 else self.weight
        x = inputs.reshape(-1, first_weight.shape[0]).astype(jnp.float32)
        adj = adj.astype(jnp.float32)
        output = gcn_forward(x, first_weight, adj)
        return output, first_weight


if __name__ == "__main__":
    key = jax.random.PRNGKey(0)
    k_in, k_adj, k_tw, k_par, k_in2, k_adj2 = jax.random.split(key, 6)

    in_features, out_features = 16, 8
    # input flattens to (N, in_features) with N = 4*8 = 32
    inputs = jax.random.normal(k_in, (4, 8, 16), jnp.float32)
    N = 32
    M = 32
    # adj must have out_features columns to match torch.spmm(adj, support.T)
    adj = (jax.random.uniform(k_adj, (M, out_features)) > 0.5).astype(jnp.float32)
    time_weight = jax.random.normal(k_tw, (in_features, out_features), jnp.float32) * 0.1

    layer = GraphConvolutionPallas(in_features, out_features,
                                   time_step=1, time_weight=time_weight,
                                   bias=False, key=k_par)

    # check the evolved weight against a pure-JAX mat_LSTM_cell reference
    def _cell_ref(q, p):
        sig = jax.nn.sigmoid
        upd = sig(p["Wu"] @ q + p["Uu"] @ q + p["bu"])
        rst = sig(p["Wr"] @ q + p["Ur"] @ q + p["br"])
        hcap = jnp.tanh(p["Wh"] @ q + p["Uh"] @ (rst * q) + p["bh"])
        return (1.0 - upd) * q + upd * hcap

    dgcn = jax.block_until_ready(layer.dgcn_weight)
    assert jnp.allclose(dgcn, _cell_ref(time_weight, layer.cell_params),
                        atol=1e-5, rtol=1e-5)

    output, first_weight = layer.forward(inputs, adj)
    output = jax.block_until_ready(output)

    # pure-JAX reference check (single-tile path, edge-masked columns)
    x = inputs.reshape(-1, in_features)
    ref = adj @ (x @ first_weight).T
    assert output.shape == (M, N)
    assert jnp.allclose(output, ref, atol=1e-4, rtol=1e-4)

    # second check: multi-tile grid + boundary masking (M=300 not a multiple
    # of tm, grid = (2, 3)) and the per-N-tile support cache across M tiles.
    x_big = jax.random.normal(k_in2, (512, in_features), jnp.float32)
    adj_big = (jax.random.uniform(k_adj2, (300, out_features)) > 0.5).astype(jnp.float32)
    out_big = jax.block_until_ready(
        gcn_forward(x_big, first_weight, adj_big, tm=128, tn=256))
    ref_big = adj_big @ (x_big @ first_weight).T
    assert out_big.shape == (300, 512)
    assert jnp.allclose(out_big, ref_big, atol=1e-3, rtol=1e-3)

    print("KERNEL_OK")
</pallas_src>

<mosaic_0001>
module attributes {stable_mosaic.version = 11 : i64} {
  func.func @_mat_lstm_cell_kernel(%arg0: i32, %arg1: memref<16x128xf32, #tpu.memory_space<vmem>>, %arg2: memref<16x16xf32, #tpu.memory_space<vmem>>, %arg3: memref<16x16xf32, #tpu.memory_space<vmem>>, %arg4: memref<16x128xf32, #tpu.memory_space<vmem>>, %arg5: memref<16x16xf32, #tpu.memory_space<vmem>>, %arg6: memref<16x16xf32, #tpu.memory_space<vmem>>, %arg7: memref<16x128xf32, #tpu.memory_space<vmem>>, %arg8: memref<16x16xf32, #tpu.memory_space<vmem>>, %arg9: memref<16x16xf32, #tpu.memory_space<vmem>>, %arg10: memref<16x128xf32, #tpu.memory_space<vmem>>, %arg11: memref<16x128xf32, #tpu.memory_space<vmem>>) attributes {dimension_semantics = [#tpu.dimension_semantics<parallel>], iteration_bounds = array<i64: 1>, scalar_prefetch = 0 : i64, scratch_operands = 0 : i64, tpu.core_type = #tpu.core_type<tc>, window_params = [{transform_indices = @transform_0, window_bounds = array<i64: 16, 128>}, {pipeline_mode = #tpu.pipeline_mode<synchronous>, transform_indices = @transform_1, window_bounds = array<i64: 16, 16>}, {pipeline_mode = #tpu.pipeline_mode<synchronous>, transform_indices = @transform_2, window_bounds = array<i64: 16, 16>}, {transform_indices = @transform_3, window_bounds = array<i64: 16, 128>}, {pipeline_mode = #tpu.pipeline_mode<synchronous>, transform_indices = @transform_4, window_bounds = array<i64: 16, 16>}, {pipeline_mode = #tpu.pipeline_mode<synchronous>, transform_indices = @transform_5, window_bounds = array<i64: 16, 16>}, {transform_indices = @transform_6, window_bounds = array<i64: 16, 128>}, {pipeline_mode = #tpu.pipeline_mode<synchronous>, transform_indices = @transform_7, window_bounds = array<i64: 16, 16>}, {pipeline_mode = #tpu.pipeline_mode<synchronous>, transform_indices = @transform_8, window_bounds = array<i64: 16, 16>}, {transform_indices = @transform_9, window_bounds = array<i64: 16, 128>}, {transform_indices = @transform_10, window_bounds = array<i64: 16, 128>}]} {
    %c0 = arith.constant 0 : index
    %c0_0 = arith.constant 0 : index
    %0 = vector.load %arg1[%c0, %c0_0] : memref<16x128xf32, #tpu.memory_space<vmem>>, vector<16x128xf32>
    %c0_1 = arith.constant 0 : index
    %c0_2 = arith.constant 0 : index
    %1 = vector.load %arg2[%c0_1, %c0_2] : memref<16x16xf32, #tpu.memory_space<vmem>>, vector<16x16xf32>
    %c0_3 = arith.constant 0 : index
    %c0_4 = arith.constant 0 : index
    %2 = vector.load %arg3[%c0_3, %c0_4] : memref<16x16xf32, #tpu.memory_space<vmem>>, vector<16x16xf32>
    %c0_5 = arith.constant 0 : index
    %c0_6 = arith.constant 0 : index
    %3 = vector.load %arg4[%c0_5, %c0_6] : memref<16x128xf32, #tpu.memory_space<vmem>>, vector<16x128xf32>
    %cst = arith.constant dense<0.000000e+00> : vector<16x128xf32>
    %4 = tpu.matmul %1, %0, %cst {dimension_numbers = #tpu.dot_dimension_numbers<[1], [0], [0], [1], [0, 0, 1, 1], [], []>} : vector<16x16xf32>, vector<16x128xf32>, vector<16x128xf32> -> vector<16x128xf32>
    %cst_7 = arith.constant dense<0.000000e+00> : vector<16x128xf32>
    %5 = tpu.matmul %2, %0, %cst_7 {dimension_numbers = #tpu.dot_dimension_numbers<[1], [0], [0], [1], [0, 0, 1, 1], [], []>} : vector<16x16xf32>, vector<16x128xf32>, vector<16x128xf32> -> vector<16x128xf32>
    %6 = arith.addf %4, %5 : vector<16x128xf32>
    %7 = arith.addf %6, %3 : vector<16x128xf32>
    %8 = arith.negf %7 : vector<16x128xf32>
    %9 = math.exp %8 : vector<16x128xf32>
    %cst_8 = arith.constant 1.000000e+00 : f32
    %10 = vector.broadcast %cst_8 : f32 to vector<16x128xf32>
    %11 = arith.addf %10, %9 : vector<16x128xf32>
    %12 = arith.divf %10, %11 : vector<16x128xf32>
    %c0_9 = arith.constant 0 : index
    %c0_10 = arith.constant 0 : index
    %13 = vector.load %arg5[%c0_9, %c0_10] : memref<16x16xf32, #tpu.memory_space<vmem>>, vector<16x16xf32>
    %c0_11 = arith.constant 0 : index
    %c0_12 = arith.constant 0 : index
    %14 = vector.load %arg6[%c0_11, %c0_12] : memref<16x16xf32, #tpu.memory_space<vmem>>, vector<16x16xf32>
    %c0_13 = arith.constant 0 : index
    %c0_14 = arith.constant 0 : index
    %15 = vector.load %arg7[%c0_13, %c0_14] : memref<16x128xf32, #tpu.memory_space<vmem>>, vector<16x128xf32>
    %cst_15 = arith.constant dense<0.000000e+00> : vector<16x128xf32>
    %16 = tpu.matmul %13, %0, %cst_15 {dimension_numbers = #tpu.dot_dimension_numbers<[1], [0], [0], [1], [0, 0, 1, 1], [], []>} : vector<16x16xf32>, vector<16x128xf32>, vector<16x128xf32> -> vector<16x128xf32>
    %cst_16 = arith.constant dense<0.000000e+00> : vector<16x128xf32>
    %17 = tpu.matmul %14, %0, %cst_16 {dimension_numbers = #tpu.dot_dimension_numbers<[1], [0], [0], [1], [0, 0, 1, 1], [], []>} : vector<16x16xf32>, vector<16x128xf32>, vector<16x128xf32> -> vector<16x128xf32>
    %18 = arith.addf %16, %17 : vector<16x128xf32>
    %19 = arith.addf %18, %15 : vector<16x128xf32>
    %20 = arith.negf %19 : vector<16x128xf32>
    %21 = math.exp %20 : vector<16x128xf32>
    %cst_17 = arith.constant 1.000000e+00 : f32
    %22 = vector.broadcast %cst_17 : f32 to vector<16x128xf32>
    %23 = arith.addf %22, %21 : vector<16x128xf32>
    %24 = arith.divf %22, %23 : vector<16x128xf32>
    %c0_18 = arith.constant 0 : index
    %c0_19 = arith.constant 0 : index
    %25 = vector.load %arg8[%c0_18, %c0_19] : memref<16x16xf32, #tpu.memory_space<vmem>>, vector<16x16xf32>
    %c0_20 = arith.constant 0 : index
    %c0_21 = arith.constant 0 : index
    %26 = vector.load %arg9[%c0_20, %c0_21] : memref<16x16xf32, #tpu.memory_space<vmem>>, vector<16x16xf32>
    %c0_22 = arith.constant 0 : index
    %c0_23 = arith.constant 0 : index
    %27 = vector.load %arg10[%c0_22, %c0_23] : memref<16x128xf32, #tpu.memory_space<vmem>>, vector<16x128xf32>
    %28 = arith.mulf %24, %0 : vector<16x128xf32>
    %cst_24 = arith.constant dense<0.000000e+00> : vector<16x128xf32>
    %29 = tpu.matmul %25, %0, %cst_24 {dimension_numbers = #tpu.dot_dimension_numbers<[1], [0], [0], [1], [0, 0, 1, 1], [], []>} : vector<16x16xf32>, vector<16x128xf32>, vector<16x128xf32> -> vector<16x128xf32>
    %cst_25 = arith.constant dense<0.000000e+00> : vector<16x128xf32>
    %30 = tpu.matmul %26, %28, %cst_25 {dimension_numbers = #tpu.dot_dimension_numbers<[1], [0], [0], [1], [0, 0, 1, 1], [], []>} : vector<16x16xf32>, vector<16x128xf32>, vector<16x128xf32> -> vector<16x128xf32>
    %31 = arith.addf %29, %30 : vector<16x128xf32>
    %32 = arith.addf %31, %27 : vector<16x128xf32>
    %33 = math.tanh %32 : vector<16x128xf32>
    %cst_26 = arith.constant 1.000000e+00 : f32
    %34 = vector.broadcast %cst_26 : f32 to vector<16x128xf32>
    %35 = arith.subf %34, %12 : vector<16x128xf32>
    %36 = arith.mulf %35, %0 : vector<16x128xf32>
    %37 = arith.mulf %12, %33 : vector<16x128xf32>
    %38 = arith.addf %36, %37 : vector<16x128xf32>
    %c0_27 = arith.constant 0 : index
    %c0_28 = arith.constant 0 : index
    %39 = vector.load %arg11[%c0_27, %c0_28] : memref<16x128xf32, #tpu.memory_space<vmem>>, vector<16x128xf32>
    tpu.vector_store %arg11[%c0_27, %c0_28], %38 {strides = array<i32>} : memref<16x128xf32, #tpu.memory_space<vmem>>, vector<16x128xf32>,
    return
  }
  func.func @transform_0(%arg0: i32) -> (i32, i32) {
    %c0_i32 = arith.constant 0 : i32
    %c0_i32_0 = arith.constant 0 : i32
    return %c0_i32, %arg0 : i32, i32
  }
  func.func @transform_1(%arg0: i32) -> (i32, i32) {
    %c0_i32 = arith.constant 0 : i32
    %c0_i32_0 = arith.constant 0 : i32
    %c0_i32_1 = arith.constant 0 : i32
    return %c0_i32, %c0_i32_0 : i32, i32
  }
  func.func @transform_2(%arg0: i32) -> (i32, i32) {
    %c0_i32 = arith.constant 0 : i32
    %c0_i32_0 = arith.constant 0 : i32
    %c0_i32_1 = arith.constant 0 : i32
    return %c0_i32, %c0_i32_0 : i32, i32
  }
  func.func @transform_3(%arg0: i32) -> (i32, i32) {
    %c0_i32 = arith.constant 0 : i32
    %c0_i32_0 = arith.constant 0 : i32
    return %c0_i32, %arg0 : i32, i32
  }
  func.func @transform_4(%arg0: i32) -> (i32, i32) {
    %c0_i32 = arith.constant 0 : i32
    %c0_i32_0 = arith.constant 0 : i32
    %c0_i32_1 = arith.constant 0 : i32
    return %c0_i32, %c0_i32_0 : i32, i32
  }
  func.func @transform_5(%arg0: i32) -> (i32, i32) {
    %c0_i32 = arith.constant 0 : i32
    %c0_i32_0 = arith.constant 0 : i32
    %c0_i32_1 = arith.constant 0 : i32
    return %c0_i32, %c0_i32_0 : i32, i32
  }
  func.func @transform_6(%arg0: i32) -> (i32, i32) {
    %c0_i32 = arith.constant 0 : i32
    %c0_i32_0 = arith.constant 0 : i32
    return %c0_i32, %arg0 : i32, i32
  }
  func.func @transform_7(%arg0: i32) -> (i32, i32) {
    %c0_i32 = arith.constant 0 : i32
    %c0_i32_0 = arith.constant 0 : i32
    %c0_i32_1 = arith.constant 0 : i32
    return %c0_i32, %c0_i32_0 : i32, i32
  }
  func.func @transform_8(%arg0: i32) -> (i32, i32) {
    %c0_i32 = arith.constant 0 : i32
    %c0_i32_0 = arith.constant 0 : i32
    %c0_i32_1 = arith.constant 0 : i32
    return %c0_i32, %c0_i32_0 : i32, i32
  }
  func.func @transform_9(%arg0: i32) -> (i32, i32) {
    %c0_i32 = arith.constant 0 : i32
    %c0_i32_0 = arith.constant 0 : i32
    return %c0_i32, %arg0 : i32, i32
  }
  func.func @transform_10(%arg0: i32) -> (i32, i32) {
    %c0_i32 = arith.constant 0 : i32
    %c0_i32_0 = arith.constant 0 : i32
    return %c0_i32, %arg0 : i32, i32
  }
}

</mosaic_0001>

<bundles_post_ra>
// kernel: tpu_custom_call.1
= control target key start
LH: loop header
LB: loop body
LE: loop exit
PB: predicated region body
PF: predicated region fallthrough
CT: control target
= control target key end

     0   :  { %vm43_vm0 = vcmask 130048   ;;  %s877_s0 = inlined_call_operand.vmem [shape: f32[16,8], index: 0, kind: input, shape index: {}]   ;;  %s878_s2 = inlined_call_operand.vmem [shape: f32[16,16], index: 2, kind: input, shape index: {}]   ;;  %s879_s1 = inlined_call_operand.vmem [shape: f32[16,16], index: 1, kind: input, shape index: {}]   ;;  %s880_s5 = inlined_call_operand.vmem [shape: f32[16,16], index: 5, kind: input, shape index: {}]   ;;  %s881_s4 = inlined_call_operand.vmem [shape: f32[16,16], index: 4, kind: input, shape index: {}]   ;;  %s882_s8 = inlined_call_operand.vmem [shape: f32[16,16], index: 8, kind: input, shape index: {}]   ;;  %s883_s6 = inlined_call_operand.vmem [shape: f32[16,8], index: 6, kind: input, shape index: {}]   ;;  %s884_s7 = inlined_call_operand.vmem [shape: f32[16,16], index: 7, kind: input, shape index: {}]   ;;  %s885_s3 = inlined_call_operand.vmem [shape: f32[16,8], index: 3, kind: input, shape index: {}]   ;;  %s886_s9 = inlined_call_operand.vmem [shape: f32[16,8], index: 9, kind: input, shape index: {}]   ;;  %s887_s10 = inlined_call_operand.vmem [shape: f32[16,8], index: 10, kind: output, shape index: {}]  }
   0x1   :  { %v780_v0 = vld [vmem:[%s877_s0] sm:$0xff]  ;;  %v785_v1 = vld [vmem:[%s877_s0 + $0x8] sm:$0xff] }
   0x2   :  { %v39_v2 = vld [vmem:[%s878_s2] sm:$0xff]  ;;  %v792_v3 = vpack.c.bf16 %v785_v1, %v780_v0  ;;  %v40_v5 = vld [vmem:[%s878_s2 + $0x8] sm:$0xff] }
   0x3   :  { %634 = vmatprep.mubr.msk.f32.mxu1 %vm43_vm0, %v39_v2  ;;  %v37_v4 = vld [vmem:[%s879_s1] sm:$0xff]  ;;  %v38_v6 = vld [vmem:[%s879_s1 + $0x8] sm:$0xff] }
   0x4   :  { %641 = vmatprep.mubr.msk.f32.mxu0 %vm43_vm0, %v37_v4  ;;  %673 = vmatprep.subr.bf16.mxu1 %v792_v3  ;;  %v222_v7 = vld [vmem:[%s880_s5] sm:$0xff]  ;;  %v223_v8 = vld [vmem:[%s880_s5 + $0x8] sm:$0xff] }
   0x5   :  { %677 = vmatprep.subr.bf16.mxu0 %v792_v3  ;;  %675 = vmatpush3.bf16.msra.mxu1 %v792_v3  ;;  %v220_v9 = vld [vmem:[%s881_s4] sm:$0xff]  ;;  %v221_v10 = vld [vmem:[%s881_s4 + $0x8] sm:$0xff] }
   0x6   :  { %679 = vmatpush3.bf16.msra.mxu0 %v792_v3  ;;  %681 = vmatprep.subr.bf16.mxu1 %v792_v3  ;;  %v404_v11 = vld [vmem:[%s882_s8] sm:$0xff]  ;;  %v225_v18 = vld [vmem:[%s883_s6 + $0x8] sm:$0xff] }
   0x7   :  { %v224_v19 = vld [vmem:[%s883_s6] sm:$0xff]  ;;  %v405_v35 = vld [vmem:[%s882_s8 + $0x8] sm:$0xff] }
   0x8   :  { %635 = vmatmul.mubr.msk.f32.vlgmr.msra.gmra.mrb[0].mxu1 %vm43_vm0, %v40_v5  ;;  %v402_v36 = vld [vmem:[%s884_s7] sm:$0xff]  ;;  %v403_v37 = vld [vmem:[%s884_s7 + $0x8] sm:$0xff] }
   0x9   :  { %642 = vmatmul.mubr.msk.f32.vlgmr.msra.gmra.mrb[0].mxu0 %vm43_vm0, %v38_v6  ;;  %683 = vmatpush3.bf16.msra.mxu1 %v792_v3  ;;  %v42_v38 = vld [vmem:[%s885_s3 + $0x8] sm:$0xff]  ;;  %v41_v39 = vld [vmem:[%s885_s3] sm:$0xff] }
   0xa   :  { %648 = vmatprep.mubr.msk.f32.mxu1 %vm43_vm0, %v222_v7  ;;  %685 = vmatprep.subr.bf16.mxu1 %v792_v3  ;;  %v407_v48 = vld [vmem:[%s886_s9 + $0x8] sm:$0xff]  ;;  %v406_v49 = vld [vmem:[%s886_s9] sm:$0xff] }
   0xb   :  { %662 = vmatprep.mubr.msk.f32.mxu0 %vm43_vm0, %v404_v11 }
   0xc   :  { %649 = vmatmul.mubr.msk.f32.vlgmr.msra.gmra.mrb[2].mxu1 %vm43_vm0, %v223_v8 }
   0xd   :  { %687 = vmatpush3.bf16.msra.mxu1 %v792_v3  ;;  %655 = vmatprep.mubr.msk.f32.mxu1 %vm43_vm0, %v220_v9 }
  0x14   :  { %656 = vmatmul.mubr.msk.f32.vlgmr.msra.gmra.mrb[2].mxu1 %vm43_vm0, %v221_v10 }
  0xdb   :  { %v636_v12 = vpop.f32.mrb[0].mxu1 }
  0xdc   :  { %v643_v13 = vpop.f32.mrb[0].mxu0  ;;  %v116_v15 = vpop.f32.mrb[1].mxu1 }
  0xdd   :  { %v203_v14 = vadd.f32 %v643_v13, %v636_v12  ;;  %v197_v16 = vpop.f32.mrb[1].mxu0 }
  0xde   :  { %v198_v17 = vadd.f32 %v197_v16, %v116_v15 }
  0xdf   :  { %v207_v40 = vadd.f32 %v203_v14, %v42_v38 }
  0xe0   :  { %v206_v41 = vadd.f32 %v198_v17, %v41_v39 }
  0xe1   :  { %v595_v42 = vmul.f32 -1.442695, %v207_v40 }
  0xe2   :  { %v594_v43 = vmul.f32 -1.442695, %v206_v41 }
  0xe7   :  { %v657_v20 = vpop.f32.mrb[2].mxu1 }
  0xe8   :  { %v389_v21 = vadd.f32 %v657_v20, %v225_v18  ;;  %v379_v22 = vpop.f32.mrb[3].mxu1 }
  0xe9   :  { %v388_v23 = vadd.f32 %v379_v22, %v224_v19 }
  0xea   :  { %v601_v24 = vmul.f32 -1.442695, %v389_v21 }
  0xeb   :  { %v600_v25 = vmul.f32 -1.442695, %v388_v23 }
  0xec   :  { %702 = vpow2.f32 %v601_v24 }
  0xed   :  { %704 = vpow2.f32 %v600_v25 }
  0xf6   :  { %v703_v26 = vpop.eup %702 }
  0xf7   :  { %v705_v27 = vpop.eup %704  ;;  %v397_v28 = vadd.f32 1.0, %v703_v26 }
  0xf8   :  { %v396_v29 = vadd.f32 1.0, %v705_v27 }
  0xf9   :  { %706 = vrcp.f32 %v397_v28 }
  0xfa   :  { %708 = vrcp.f32 %v396_v29 }
  0xfb   :  { %710 = vpow2.f32 %v595_v42 }
  0xfc   :  { %712 = vpow2.f32 %v594_v43 }
 0x103   :  { %v707_v30 = vpop.eup %706 }
 0x104   :  { %v709_v31 = vpop.eup %708  ;;  %v409_v32 = vmul.f32 %v707_v30, %v785_v1 }
 0x105   :  { %v408_v33 = vmul.f32 %v709_v31, %v780_v0  ;;  %v711_v44 = vpop.eup %710 }
 0x106   :  { %v713_v45 = vpop.eup %712  ;;  %v215_v46 = vadd.f32 1.0, %v711_v44 }
 0x107   :  { %v688_v34 = vpack.c.bf16 %v409_v32, %v408_v33  ;;  %v214_v47 = vadd.f32 1.0, %v713_v45 }
 0x108   :  { %714 = vrcp.f32 %v215_v46 }
 0x109   :  { %689 = vmatprep.subr.bf16.mxu0 %v688_v34  ;;  %716 = vrcp.f32 %v214_v47 }
 0x10a   :  { %691 = vmatpush3.bf16.msra.mxu0 %v688_v34 }
 0x10b   :  { %693 = vmatprep.subr.bf16.mxu0 %v792_v3 }
 0x10d   :  { %663 = vmatmul.mubr.msk.f32.vlgmr.msra.gmra.mrb[2].mxu0 %vm43_vm0, %v405_v35 }
 0x10e   :  { %695 = vmatpush3.bf16.msra.mxu0 %v792_v3  ;;  %669 = vmatprep.mubr.msk.f32.mxu0 %vm43_vm0, %v402_v36 }
 0x112   :  { %v715_v54 = vpop.eup %714 }
 0x113   :  { %v717_v55 = vpop.eup %716  ;;  %v577_v56 = vsub.f32 1.0, %v715_v54 }
 0x114   :  { %v576_v57 = vsub.f32 1.0, %v717_v55 }
 0x115   :  { %670 = vmatmul.mubr.msk.f32.vlgmr.msra.gmra.mrb[2].mxu0 %vm43_vm0, %v403_v37  ;;  %v579_v60 = vmul.f32 %v577_v56, %v785_v1 }
 0x116   :  { %v578_v62 = vmul.f32 %v576_v57, %v780_v0 }
 0x1e8   :  { %v671_v50 = vpop.f32.mrb[2].mxu0 }
 0x1e9   :  { %v573_v51 = vadd.f32 %v671_v50, %v407_v48  ;;  %v563_v52 = vpop.f32.mrb[3].mxu0 }
 0x1ea   :  { %v572_v53 = vadd.f32 %v563_v52, %v406_v49 }
 0x1eb   :  { %718 = vtanh.f32 %v573_v51 }
 0x1ec   :  { %720 = vtanh.f32 %v572_v53 }
 0x1f5   :  { %v719_v58 = vpop.eup %718 }
 0x1f6   :  { %v721_v59 = vpop.eup %720  ;;  %v581_v61 = vmul.f32 %v719_v58, %v715_v54 }
 0x1f7   :  { %v580_v63 = vmul.f32 %v721_v59, %v717_v55 }
 0x1f8   :  { %v583_v2 = vadd.f32 %v581_v61, %v579_v60 }
 0x1f9   :  { %v582_v3 = vadd.f32 %v580_v63, %v578_v62 }
 0x1fa   :  { %585 = vst [vmem:[%s887_s10 + $0x8] sm:$0xff] %v583_v2 }
 0x1fb   :  { %584 = vst [vmem:[%s887_s10] sm:$0xff] %v582_v3 }

</bundles_post_ra>
